<compile_context>
chip_gen: v7x
topology: tpu7x:2x2x1
jax: 0.10.0
libtpu: 0.0.40
codegen_flags: <defaults>
</compile_context>

<pallas_src>
import math

import jax
import jax.numpy as jnp
from jax.experimental import pallas as pl
from jax.experimental.pallas import tpu as pltpu

_MIB = 1024 * 1024


def _round_up(x, m):
    return ((x + m - 1) // m) * m


def _tpu_generation():
    """Return (vmem_capacity_bytes, two_tensorcores, wide_mxu)."""
    kind = ""
    try:
        kind = jax.devices()[0].device_kind.lower()
    except Exception:
        pass
    is_v7 = ("v7" in kind) or ("tpu7" in kind)
    try:
        vmem = int(pltpu.get_tpu_info().vmem_capacity_bytes)
    except Exception:
        # v5e/v6e: 128 MiB per TensorCore; v7x: 64 MiB.  Unknown -> conservative.
        vmem = 128 * _MIB if (kind and not is_v7) else 64 * _MIB
    wide_mxu = not ("v5" in kind)          # v6e / v7x MXU is 256 lanes wide
    return vmem, is_v7, wide_mxu


# ---------------------------------------------------------------------------
# Kernels
# ---------------------------------------------------------------------------
def _noisy_train_kernel(x_ref, wmu_ref, wsig_ref, eps_in_ref, eps_out_ref,
                        bias_ref, o_ref):
    # y = x @ Wmu^T + eps_out * ((x * eps_in) @ Wsig^T) + bias_eff
    # Weights arrive pre-transposed as (In_p, tile_out): two plain NN MXU
    # matmuls; the noisy weight tile is never materialized in VMEM.
    x = x_ref[...]
    acc = jnp.dot(x, wmu_ref[...], preferred_element_type=jnp.float32)
    x_noisy = (x.astype(jnp.float32) * eps_in_ref[...]).astype(wsig_ref.dtype)
    acc += eps_out_ref[...] * jnp.dot(x_noisy, wsig_ref[...],
                                      preferred_element_type=jnp.float32)
    o_ref[...] = (acc + bias_ref[...]).astype(o_ref.dtype)


def _noisy_eval_kernel(x_ref, wmu_ref, bias_ref, o_ref):
    acc = jnp.dot(x_ref[...], wmu_ref[...], preferred_element_type=jnp.float32)
    o_ref[...] = (acc + bias_ref[...]).astype(o_ref.dtype)


# ---------------------------------------------------------------------------
# One-time parameter preparation (pad + transpose + dtype once, not per call)
# ---------------------------------------------------------------------------
def prepare_noisy_linear(weight_mu, weight_sigma, bias_mu, bias_sigma, *,
                         compute_dtype=jnp.float32, max_batch=128,
                         tile_out=None):
    """Choose the output tile and store weights padded + transposed to
    (In_p, Out_p) in the streaming dtype.  Call once (or once per optimizer
    step for bf16 shadow copies), NOT on every forward."""
    Out, In = weight_mu.shape
    In_p = _round_up(In, 128)
    vmem, two_cores, _wide_mxu = _tpu_generation()

    w_bytes = jnp.dtype(compute_dtype).itemsize
    b_hint = min(_round_up(max(int(max_batch), 8), 8), 512)

    if tile_out is None:
        budget = int(0.70 * vmem)

        def need(t):
            return (2 * b_hint * In_p * w_bytes            # x block (dbl-buffered)
                    + 2 * 2 * In_p * t * w_bytes           # mu+sigma tiles (dbl-buf)
                    + 2 * b_hint * t * 4                   # output (dbl-buffered)
                    + 4 * (In_p + 3 * t) * 4)              # eps / bias rows

        min_out_p = _round_up(Out, 128)
        tile_out = 128
        # Largest-first => 256-multiples preferred on v6e/v7x automatically.
        for t in (2048, 1024, 512, 256, 128):
            if need(t) > budget:
                continue
            out_p = _round_up(Out, t)
            # Bound padded-Out waste: padded rows still cost full weight DMA.
            if out_p > min_out_p and (out_p - Out) / max(Out, 1) > 0.15:
                continue
            tile_out = t
            break
        # v7x: dimension_semantics shards grid steps across the 2 TensorCores;
        # make sure there are >= 2 output tiles when possible.
        if two_cores and _round_up(Out, tile_out) // tile_out < 2 and tile_out > 128:
            tile_out //= 2

    Out_p = _round_up(Out, tile_out)

    w_mu_t = jnp.zeros((In_p, Out_p), compute_dtype)
    w_mu_t = w_mu_t.at[:In, :Out].set(weight_mu.T.astype(compute_dtype))
    w_sig_t = jnp.zeros((In_p, Out_p), compute_dtype)
    w_sig_t = w_sig_t.at[:In, :Out].set(weight_sigma.T.astype(compute_dtype))

    return dict(
        w_mu_t=w_mu_t, w_sig_t=w_sig_t,
        bias_mu=jnp.asarray(bias_mu, jnp.float32),
        bias_sigma=jnp.asarray(bias_sigma, jnp.float32),
        in_features=In, out_features=Out,
        In_p=In_p, Out_p=Out_p, tile_out=tile_out,
        compute_dtype=compute_dtype, vmem=vmem,
    )


# ---------------------------------------------------------------------------
# Forward wrapper
# ---------------------------------------------------------------------------
def noisy_linear_forward(prepped, x, epsilon_in, epsilon_out, *, training=True):
    """NoisyLinear.forward.  epsilon_in (In,) / epsilon_out (Out,) are the
    factored noise vectors from reset_noise(); the module's dense buffers are
    weight_epsilon == outer(eps_out, eps_in) and bias_epsilon == eps_out."""
    In, Out = prepped["in_features"], prepped["out_features"]
    In_p, Out_p = prepped["In_p"], prepped["Out_p"]
    tile_out = prepped["tile_out"]
    cdt = prepped["compute_dtype"]
    vmem = prepped["vmem"]
    out_dtype = x.dtype

    x_bytes = jnp.dtype(cdt).itemsize
    B = x.shape[0]

    # Batch tiling: keep the double-buffered x block inside its VMEM share
    # (matters for very large B*In, especially on 64 MiB v7x parts).
    x_budget = max(4 * _MIB, int(0.25 * vmem))
    tile_b = _round_up(B, 8)
    while tile_b > 8 and 2 * tile_b * In_p * x_bytes > x_budget:
        tile_b = _round_up(tile_b // 2, 8)
    B_p = _round_up(B, tile_b)

    # Only activations / tiny rows are padded per call (cheap); the big weight
    # arrays were padded once in prepare_noisy_linear().  Padded In columns
    # are exact zeros, padded Out columns / batch rows are sliced off below.
    xp = jnp.zeros((B_p, In_p), cdt).at[:B, :In].set(x.astype(cdt))

    n_w = 2 if training else 1
    need = (2 * tile_b * In_p * x_bytes
            + 2 * n_w * In_p * tile_out * x_bytes
            + 2 * tile_b * tile_out * jnp.dtype(out_dtype).itemsize
            + 4 * (In_p + 3 * tile_out) * 4)
    vmem_limit = int(min(0.85 * vmem, max(32 * _MIB, 2 * need)))

    # Out-tiles outer, batch-tiles inner: each weight tile is DMA'd exactly once.
    grid = (Out_p // tile_out, B_p // tile_b)

    x_spec = pl.BlockSpec((tile_b, In_p), lambda j, i: (i, 0))
    w_spec = pl.BlockSpec((In_p, tile_out), lambda j, i: (0, j))
    row_in_spec = pl.BlockSpec((1, In_p), lambda j, i: (0, 0))
    row_out_spec = pl.BlockSpec((1, tile_out), lambda j, i: (0, j))
    out_spec = pl.BlockSpec((tile_b, tile_out), lambda j, i: (i, j))   # lane-dense

    cp = pltpu.CompilerParams(dimension_semantics=("parallel", "parallel"),
                              vmem_limit_bytes=vmem_limit)

    if training:
        eps_in_row = jnp.zeros((1, In_p), jnp.float32).at[0, :In].set(
            epsilon_in.astype(jnp.float32))
        eps_out_row = jnp.zeros((1, Out_p), jnp.float32).at[0, :Out].set(
            epsilon_out.astype(jnp.float32))
        bias_eff = prepped["bias_mu"] + prepped["bias_sigma"] * epsilon_out.astype(jnp.float32)
        bias_row = jnp.zeros((1, Out_p), jnp.float32).at[0, :Out].set(bias_eff)

        yp = pl.pallas_call(
            _noisy_train_kernel,
            out_shape=jax.ShapeDtypeStruct((B_p, Out_p), out_dtype),
            grid=grid,
            in_specs=[x_spec, w_spec, w_spec, row_in_spec, row_out_spec,
                      row_out_spec],
            out_specs=out_spec,
            compiler_params=cp,
        )(xp, prepped["w_mu_t"], prepped["w_sig_t"], eps_in_row, eps_out_row,
          bias_row)
    else:
        bias_row = jnp.zeros((1, Out_p), jnp.float32).at[0, :Out].set(
            prepped["bias_mu"])
        yp = pl.pallas_call(
            _noisy_eval_kernel,
            out_shape=jax.ShapeDtypeStruct((B_p, Out_p), out_dtype),
            grid=grid,
            in_specs=[x_spec, w_spec, row_out_spec],
            out_specs=out_spec,
            compiler_params=cp,
        )(xp, prepped["w_mu_t"], bias_row)

    return yp[:B, :Out]


# ---------------------------------------------------------------------------
# Parameter / noise initialization (mirrors NoisyLinear.__init__ / reset_noise)
# ---------------------------------------------------------------------------
def _scale_noise(key, size):
    # torch: x.sign() * x.abs().sqrt() with x ~ N(0, 1)
    x = jax.random.normal(key, (size,), dtype=jnp.float32)
    return jnp.sign(x) * jnp.sqrt(jnp.abs(x))


def init_noisy_linear_params(key, in_features, out_features, sigma_init=0.017):
    k_wmu, k_bmu = jax.random.split(key)
    bound = 1.0 / math.sqrt(in_features)
    weight_mu = jax.random.uniform(k_wmu, (out_features, in_features),
                                   minval=-bound, maxval=bound, dtype=jnp.float32)
    weight_sigma = jnp.full((out_features, in_features),
                            sigma_init / math.sqrt(in_features), jnp.float32)
    bias_mu = jax.random.uniform(k_bmu, (out_features,), minval=-bound,
                                 maxval=bound, dtype=jnp.float32)
    bias_sigma = jnp.full((out_features,),
                          sigma_init / math.sqrt(out_features), jnp.float32)
    return weight_mu, weight_sigma, bias_mu, bias_sigma


if __name__ == "__main__":
    key = jax.random.PRNGKey(0)
    k_param, k_ein, k_eout, k_x = jax.random.split(key, 4)

    batch, in_features, out_features = 4, 32, 16
    weight_mu, weight_sigma, bias_mu, bias_sigma = init_noisy_linear_params(
        k_param, in_features, out_features)
    epsilon_in = _scale_noise(k_ein, in_features)      # (In,)
    epsilon_out = _scale_noise(k_eout, out_features)   # (Out,)
    x = jax.random.normal(k_x, (batch, in_features), dtype=jnp.float32)

    # Pure-JAX reference using the module's dense buffers.
    weight_epsilon = jnp.outer(epsilon_out, epsilon_in)
    w_eff = weight_mu + weight_sigma * weight_epsilon
    b_eff = bias_mu + bias_sigma * epsilon_out
    y_train_ref = x @ w_eff.T + b_eff
    y_eval_ref = x @ weight_mu.T + bias_mu

    # f32 streaming path (strict tolerance).
    prepped = prepare_noisy_linear(weight_mu, weight_sigma, bias_mu, bias_sigma,
                                   compute_dtype=jnp.float32, max_batch=batch)
    y_train = jax.block_until_ready(
        noisy_linear_forward(prepped, x, epsilon_in, epsilon_out, training=True))
    assert jnp.allclose(y_train, y_train_ref, atol=1e-5, rtol=1e-5), \
        "train (f32) mismatch vs reference"

    y_eval = jax.block_until_ready(
        noisy_linear_forward(prepped, x, epsilon_in, epsilon_out, training=False))
    assert jnp.allclose(y_eval, y_eval_ref, atol=1e-5, rtol=1e-5), \
        "eval (f32) mismatch vs reference"

    # bf16 weight/x streaming with f32 accumulation (halves weight HBM bytes).
    prepped_bf16 = prepare_noisy_linear(weight_mu, weight_sigma, bias_mu,
                                        bias_sigma, compute_dtype=jnp.bfloat16,
                                        max_batch=batch)
    y_bf16 = jax.block_until_ready(
        noisy_linear_forward(prepped_bf16, x, epsilon_in, epsilon_out,
                             training=True))
    assert jnp.allclose(y_bf16, y_train_ref, atol=5e-2, rtol=5e-2), \
        "train (bf16) mismatch vs reference"

    print("KERNEL_OK")
</pallas_src>

<mosaic_0001>
module attributes {stable_mosaic.version = 11 : i64} {
  func.func @_noisy_train_kernel(%arg0: i32, %arg1: i32, %arg2: memref<8x128xf32, #tpu.memory_space<vmem>>, %arg3: memref<128x128xf32, #tpu.memory_space<vmem>>, %arg4: memref<128x128xf32, #tpu.memory_space<vmem>>, %arg5: memref<1x128xf32, #tpu.memory_space<vmem>>, %arg6: memref<1x128xf32, #tpu.memory_space<vmem>>, %arg7: memref<1x128xf32, #tpu.memory_space<vmem>>, %arg8: memref<8x128xf32, #tpu.memory_space<vmem>>) attributes {dimension_semantics = [#tpu.dimension_semantics<parallel>, #tpu.dimension_semantics<parallel>], iteration_bounds = array<i64: 1, 1>, scalar_prefetch = 0 : i64, scratch_operands = 0 : i64, tpu.core_type = #tpu.core_type<tc>, window_params = [{transform_indices = @transform_0, window_bounds = array<i64: 8, 128>}, {transform_indices = @transform_1, window_bounds = array<i64: 128, 128>}, {transform_indices = @transform_2, window_bounds = array<i64: 128, 128>}, {pipeline_mode = #tpu.pipeline_mode<synchronous>, transform_indices = @transform_3, window_bounds = array<i64: 1, 128>}, {transform_indices = @transform_4, window_bounds = array<i64: 1, 128>}, {transform_indices = @transform_5, window_bounds = array<i64: 1, 128>}, {transform_indices = @transform_6, window_bounds = array<i64: 8, 128>}]} {
    %c0 = arith.constant 0 : index
    %c0_0 = arith.constant 0 : index
    %0 = vector.load %arg2[%c0, %c0_0] : memref<8x128xf32, #tpu.memory_space<vmem>>, vector<8x128xf32>
    %c0_1 = arith.constant 0 : index
    %c0_2 = arith.constant 0 : index
    %1 = vector.load %arg3[%c0_1, %c0_2] : memref<128x128xf32, #tpu.memory_space<vmem>>, vector<128x128xf32>
    %cst = arith.constant dense<0.000000e+00> : vector<8x128xf32>
    %2 = tpu.matmul %0, %1, %cst {dimension_numbers = #tpu.dot_dimension_numbers<[1], [0], [0], [1], [0, 0, 1, 1], [], []>} : vector<8x128xf32>, vector<128x128xf32>, vector<8x128xf32> -> vector<8x128xf32>
    %c0_3 = arith.constant 0 : index
    %c0_4 = arith.constant 0 : index
    %3 = vector.load %arg5[%c0_3, %c0_4] : memref<1x128xf32, #tpu.memory_space<vmem>>, vector<1x128xf32>
    %4 = vector.broadcast %3 : vector<1x128xf32> to vector<8x128xf32>
    %5 = arith.mulf %0, %4 : vector<8x128xf32>
    %c0_5 = arith.constant 0 : index
    %c0_6 = arith.constant 0 : index
    %6 = vector.load %arg6[%c0_5, %c0_6] : memref<1x128xf32, #tpu.memory_space<vmem>>, vector<1x128xf32>
    %c0_7 = arith.constant 0 : index
    %c0_8 = arith.constant 0 : index
    %7 = vector.load %arg4[%c0_7, %c0_8] : memref<128x128xf32, #tpu.memory_space<vmem>>, vector<128x128xf32>
    %cst_9 = arith.constant dense<0.000000e+00> : vector<8x128xf32>
    %8 = tpu.matmul %5, %7, %cst_9 {dimension_numbers = #tpu.dot_dimension_numbers<[1], [0], [0], [1], [0, 0, 1, 1], [], []>} : vector<8x128xf32>, vector<128x128xf32>, vector<8x128xf32> -> vector<8x128xf32>
    %9 = vector.broadcast %6 : vector<1x128xf32> to vector<8x128xf32>
    %10 = arith.mulf %9, %8 : vector<8x128xf32>
    %11 = arith.addf %2, %10 : vector<8x128xf32>
    %c0_10 = arith.constant 0 : index
    %c0_11 = arith.constant 0 : index
    %12 = vector.load %arg7[%c0_10, %c0_11] : memref<1x128xf32, #tpu.memory_space<vmem>>, vector<1x128xf32>
    %13 = vector.broadcast %12 : vector<1x128xf32> to vector<8x128xf32>
    %14 = arith.addf %11, %13 : vector<8x128xf32>
    %c0_12 = arith.constant 0 : index
    %c0_13 = arith.constant 0 : index
    %15 = vector.load %arg8[%c0_12, %c0_13] : memref<8x128xf32, #tpu.memory_space<vmem>>, vector<8x128xf32>
    tpu.vector_store %arg8[%c0_12, %c0_13], %14 {strides = array<i32>} : memref<8x128xf32, #tpu.memory_space<vmem>>, vector<8x128xf32>,
    return
  }
  func.func @transform_0(%arg0: i32, %arg1: i32) -> (i32, i32) {
    %c0_i32 = arith.constant 0 : i32
    %c0_i32_0 = arith.constant 0 : i32
    return %arg1, %c0_i32 : i32, i32
  }
  func.func @transform_1(%arg0: i32, %arg1: i32) -> (i32, i32) {
    %c0_i32 = arith.constant 0 : i32
    %c0_i32_0 = arith.constant 0 : i32
    return %c0_i32, %arg0 : i32, i32
  }
  func.func @transform_2(%arg0: i32, %arg1: i32) -> (i32, i32) {
    %c0_i32 = arith.constant 0 : i32
    %c0_i32_0 = arith.constant 0 : i32
    return %c0_i32, %arg0 : i32, i32
  }
  func.func @transform_3(%arg0: i32, %arg1: i32) -> (i32, i32) {
    %c0_i32 = arith.constant 0 : i32
    %c0_i32_0 = arith.constant 0 : i32
    %c0_i32_1 = arith.constant 0 : i32
    return %c0_i32, %c0_i32_0 : i32, i32
  }
  func.func @transform_4(%arg0: i32, %arg1: i32) -> (i32, i32) {
    %c0_i32 = arith.constant 0 : i32
    %c0_i32_0 = arith.constant 0 : i32
    return %c0_i32, %arg0 : i32, i32
  }
  func.func @transform_5(%arg0: i32, %arg1: i32) -> (i32, i32) {
    %c0_i32 = arith.constant 0 : i32
    %c0_i32_0 = arith.constant 0 : i32
    return %c0_i32, %arg0 : i32, i32
  }
  func.func @transform_6(%arg0: i32, %arg1: i32) -> (i32, i32) {
    %c0_i32 = arith.constant 0 : i32
    return %arg1, %arg0 : i32, i32
  }
}

</mosaic_0001>

<bundles_post_ra>
// kernel: tpu_custom_call.1
= control target key start
LH: loop header
LB: loop body
LE: loop exit
PB: predicated region body
PF: predicated region fallthrough
CT: control target
= control target key end

     0   :  { %11 = vsyncpa [#allocation3], 0  ;;  %s658_s0 = inlined_call_operand.hbm [shape: f32[8,128], index: 0, kind: input, shape index: {}]   ;;  %s659_s1 = inlined_call_operand.hbm [shape: f32[128,128], index: 1, kind: input, shape index: {}]   ;;  %s660_s2 = inlined_call_operand.hbm [shape: f32[128,128], index: 2, kind: input, shape index: {}]   ;;  %s661_s3 = inlined_call_operand.vmem [shape: f32[1,128], index: 3, kind: input, shape index: {}]   ;;  %s662_s4 = inlined_call_operand.vmem [shape: f32[1,128], index: 4, kind: input, shape index: {}]   ;;  %s663_s5 = inlined_call_operand.vmem [shape: f32[1,128], index: 5, kind: input, shape index: {}]   ;;  %s664_s6 = inlined_call_operand.hbm [shape: f32[8,128], index: 6, kind: output, shape index: {}]  }
   0x1   :  { %12 = vsyncpa [#allocation6], 0 }
   0x2   :  { %13 = vsyncpa [#allocation4], 0  ;;  %s535_s21 = smov [#allocation5]   ;;  %s441_s25 = scalar_lea.hbm %s659_s1, 2048 }
   0x3   :  { %s29_s22 = sshll.u32 %s535_s21, 4  ;;  %p442_p0 = scmp.ne.s32.totalorder %s659_s1, %s441_s25  ;;  %s30_s22 = int_to_ptr.vmem [resolvable:$true] %s29_s22 }
   0x4   :  { %p445_p1 = scmp.lt.u32.totalorder %s441_s25, %s659_s1 }
   0x6   :  { %p447_p2 = pnand %p445_p1, %p442_p0 }
   0x8   :  { %450 = shalt.err (!%p447_p2)
}
   0x9   :  { %s451_s30 = scalar_lea.vmem %s30_s22, 2048  ;;  %p456_p4 = scmp.lt.s32.totalorder %s30_s22, %s30_s22 }
   0xa   :  { %p452_p3 = scmp.ne.s32.totalorder %s30_s22, %s451_s30  ;;  %p457_p5 = scmp.lt.s32.totalorder %s451_s30, %s451_s30 }
   0xc   :  { %p458_p6 = por %p457_p5, %p456_p4 }
   0xe   :  { %p459_p7 = pnand %p458_p6, %p452_p3 }
  0x10   :  { %462 = shalt.err (!%p459_p7)
}
  0x11   :  { %s536_s7 = smov 128   ;;  %s537_s8 = smov 8  }
  0x12   :  { %35 = dma.hbm_to_vmem [thread:$0]  %s659_s1, 2048, %s30_s22, [#allocation6], %s536_s7, %s536_s7, %s537_s8  }
  0x13   :  { %s538_s11 = smov [#allocation2]   ;;  %s539_s13 = smov [#allocation7]  }
  0x14   :  { %s20_s12 = sshll.u32 %s538_s11, 4  ;;  %s41_s14 = sshll.u32 %s539_s13, 4  ;;  %s21_s12 = int_to_ptr.vmem [resolvable:$true] %s20_s12  ;;  %s42_s14 = int_to_ptr.vmem [resolvable:$true] %s41_s14 }
  0x15   :  { %s463_s17 = scalar_lea.hbm %s658_s0, 128 }
  0x16   :  { %p464_p8 = scmp.ne.s32.totalorder %s658_s0, %s463_s17  ;;  %p467_p9 = scmp.lt.u32.totalorder %s463_s17, %s658_s0 }
  0x18   :  { %p469_p10 = pnand %p467_p9, %p464_p8 }
  0x1a   :  { %472 = shalt.err (!%p469_p10)
}
  0x1b   :  { %s473_s1 = scalar_lea.vmem %s21_s12, 128  ;;  %p478_p12 = scmp.lt.s32.totalorder %s21_s12, %s21_s12 }
  0x1c   :  { %p474_p11 = scmp.ne.s32.totalorder %s21_s12, %s473_s1  ;;  %p479_p13 = scmp.lt.s32.totalorder %s473_s1, %s473_s1 }
  0x1e   :  { %p480_p0 = por %p479_p13, %p478_p12 }
  0x20   :  { %p481_p1 = pnand %p480_p0, %p474_p11 }
  0x22   :  { %484 = shalt.err (!%p481_p1)
}
  0x23   :  { %23 = dma.hbm_to_vmem [thread:$0]  %s658_s0, 128, %s21_s12, [#allocation3]  }
  0x24   :  { %s485_s26 = scalar_lea.hbm %s660_s2, 2048 }
  0x25   :  { %p486_p2 = scmp.ne.s32.totalorder %s660_s2, %s485_s26  ;;  %p489_p3 = scmp.lt.u32.totalorder %s485_s26, %s660_s2 }
  0x27   :  { %p491_p4 = pnand %p489_p3, %p486_p2 }
  0x29   :  { %494 = shalt.err (!%p491_p4)
}
  0x2a   :  { %s495_s9 = scalar_lea.vmem %s42_s14, 2048  ;;  %p500_p6 = scmp.lt.s32.totalorder %s42_s14, %s42_s14 }
  0x2b   :  { %p496_p5 = scmp.ne.s32.totalorder %s42_s14, %s495_s9  ;;  %p501_p7 = scmp.lt.s32.totalorder %s495_s9, %s495_s9 }
  0x2d   :  { %p502_p8 = por %p501_p7, %p500_p6 }
  0x2f   :  { %p503_p9 = pnand %p502_p8, %p496_p5 }
  0x31   :  { %506 = shalt.err (!%p503_p9)
}
  0x32   :  { %47 = dma.hbm_to_vmem [thread:$0]  %s660_s2, 2048, %s42_s14, [#allocation6], %s536_s7, %s536_s7, %s537_s8  }
  0x33   :  { %529 = dma.done.wait [#allocation3], 128  }
  0x34   :  { %530 = vsyncadd [#allocation3], 4294967168 }
  0x35   :  { %531 = dma.done.wait [#allocation6], 4096  }
  0x36   :  { %532 = vsyncadd [#allocation6], 4294963200  ;;  %v540_v0 = vmov 0.0|0.0   ;;  %vm541_vm0 = vmmov 0   ;;  %v542_v1 = vmov 0.0   ;;  %v89_v2 = vld [vmem:[#allocation7] sm:$0xff] }
  0x37   :  { %384 = vmatprep.subr.bf16.mxu0 %v540_v0  ;;  %408 = vmatprep.subr.bf16.mxu1 %v540_v0  ;;  %v90_v3 = vld [vmem:[#allocation7 + $0x8] sm:$0xff]  ;;  %v64_v4 = vld [vmem:[#allocation5] sm:$0xff]  ;;  %v91_v7 = vld [vmem:[#allocation7 + $0x10] sm:$0xff]  ;;  %s543_s13 = smov [#allocation8]  }
  0x38   :  { %346 = vmatprep.mubr.msk.f32.mxu0 %vm541_vm0, %v542_v1  ;;  %381 = vmatprep.mubr.msk.f32.mxu1 %vm541_vm0, %v542_v1  ;;  %v385_v5 = vpack.c.bf16 %v90_v3, %v89_v2  ;;  %v65_v6 = vld [vmem:[#allocation5 + $0x8] sm:$0xff]  ;;  %v92_v8 = vld [vmem:[#allocation7 + $0x18] sm:$0xff]  ;;  %v66_v10 = vld [vmem:[#allocation5 + $0x10] sm:$0xff]  ;;  %s267_s14 = sshll.u32 %s543_s13, 4  ;;  %s268_s14 = int_to_ptr.vmem [resolvable:$true] %s267_s14 }
  0x39   :  { %v409_v9 = vpack.c.bf16 %v65_v6, %v64_v4  ;;  %v67_v11 = vld [vmem:[#allocation5 + $0x18] sm:$0xff]  ;;  %v388_v12 = vpack.c.bf16 %v92_v8, %v91_v7  ;;  %v93_v14 = vld [vmem:[#allocation7 + $0x20] sm:$0xff]  ;;  %v94_v15 = vld [vmem:[#allocation7 + $0x28] sm:$0xff]  ;;  %s507_s15 = scalar_lea.vmem %s268_s14, 128  ;;  %p512_p11 = scmp.lt.s32.totalorder %s268_s14, %s268_s14 }
  0x3a   :  { %386 = vmatpush3.bf16.msra.mxu0 %v385_v5  ;;  %v412_v13 = vpack.c.bf16 %v67_v11, %v66_v10  ;;  %v68_v16 = vld [vmem:[#allocation5 + $0x20] sm:$0xff]  ;;  %v69_v17 = vld [vmem:[#allocation5 + $0x28] sm:$0xff]  ;;  %v391_v18 = vpack.c.bf16 %v94_v15, %v93_v14  ;;  %v95_v20 = vld [vmem:[#allocation7 + $0x30] sm:$0xff]  ;;  %p508_p10 = scmp.ne.s32.totalorder %s268_s14, %s507_s15  ;;  %p513_p12 = scmp.lt.s32.totalorder %s507_s15, %s507_s15 }
  0x3b   :  { %410 = vmatpush3.bf16.msra.mxu1 %v409_v9  ;;  %387 = vmatprep.subr.bf16.mxu0 %v540_v0  ;;  %v415_v19 = vpack.c.bf16 %v69_v17, %v68_v16  ;;  %v96_v21 = vld [vmem:[#allocation7 + $0x38] sm:$0xff]  ;;  %v70_v22 = vld [vmem:[#allocation5 + $0x30] sm:$0xff]  ;;  %v97_v26 = vld [vmem:[#allocation7 + $0x40] sm:$0xff] }
  0x3c   :  { %411 = vmatprep.subr.bf16.mxu1 %v540_v0  ;;  %v71_v23 = vld [vmem:[#allocation5 + $0x38] sm:$0xff]  ;;  %v394_v24 = vpack.c.bf16 %v96_v21, %v95_v20  ;;  %v98_v27 = vld [vmem:[#allocation7 + $0x48] sm:$0xff]  ;;  %v72_v28 = vld [vmem:[#allocation5 + $0x40] sm:$0xff]  ;;  %p514_p13 = por %p513_p12, %p512_p11 }
  0x3d   :  { %v418_v25 = vpack.c.bf16 %v71_v23, %v70_v22  ;;  %v73_v29 = vld [vmem:[#allocation5 + $0x48] sm:$0xff]  ;;  %v397_v30 = vpack.c.bf16 %v98_v27, %v97_v26  ;;  %v99_v32 = vld [vmem:[#allocation7 + $0x50] sm:$0xff]  ;;  %v100_v33 = vld [vmem:[#allocation7 + $0x58] sm:$0xff] }
  0x3e   :  { %389 = vmatpush3.bf16.msra.mxu0 %v388_v12  ;;  %v421_v31 = vpack.c.bf16 %v73_v29, %v72_v28  ;;  %v74_v34 = vld [vmem:[#allocation5 + $0x50] sm:$0xff]  ;;  %v75_v35 = vld [vmem:[#allocation5 + $0x58] sm:$0xff]  ;;  %v400_v36 = vpack.c.bf16 %v100_v33, %v99_v32  ;;  %v101_v38 = vld [vmem:[#allocation7 + $0x60] sm:$0xff]  ;;  %p515_p0 = pnand %p514_p13, %p508_p10 }
  0x3f   :  { %413 = vmatpush3.bf16.msra.mxu1 %v412_v13  ;;  %390 = vmatprep.subr.bf16.mxu0 %v540_v0  ;;  %v424_v37 = vpack.c.bf16 %v75_v35, %v74_v34  ;;  %v102_v39 = vld [vmem:[#allocation7 + $0x68] sm:$0xff]  ;;  %v76_v40 = vld [vmem:[#allocation5 + $0x60] sm:$0xff]  ;;  %v103_v44 = vld [vmem:[#allocation7 + $0x70] sm:$0xff] }
  0x40   :  { %414 = vmatprep.subr.bf16.mxu1 %v540_v0  ;;  %v77_v41 = vld [vmem:[#allocation5 + $0x68] sm:$0xff]  ;;  %v403_v42 = vpack.c.bf16 %v102_v39, %v101_v38  ;;  %v104_v45 = vld [vmem:[#allocation7 + $0x78] sm:$0xff]  ;;  %v78_v46 = vld [vmem:[#allocation5 + $0x70] sm:$0xff] }
  0x41   :  { %v427_v43 = vpack.c.bf16 %v77_v41, %v76_v40  ;;  %v79_v47 = vld [vmem:[#allocation5 + $0x78] sm:$0xff]  ;;  %v406_v48 = vpack.c.bf16 %v104_v45, %v103_v44 }
  0x42   :  { %392 = vmatpush3.bf16.msra.mxu0 %v391_v18  ;;  %v63_v49 = vld [vmem:[#allocation2] sm:$0xff]  ;;  %v430_v51 = vpack.c.bf16 %v79_v47, %v78_v46 }
  0x43   :  { %416 = vmatpush3.bf16.msra.mxu1 %v415_v19  ;;  %393 = vmatprep.subr.bf16.mxu0 %v540_v0  ;;  %v277_v50 = vld [vmem:[%s661_s3] ss:$0 sm:$0xff] }
  0x44   :  { %417 = vmatprep.subr.bf16.mxu1 %v540_v0  ;;  %v87_v52 = vmul.f32 %v277_v50, %v63_v49  ;;  %v278_v53 = vld [vmem:[%s662_s4] ss:$0 sm:$0xff] }
  0x45   :  { %v279_v58 = vld [vmem:[%s663_s5] ss:$0 sm:$0xff] }
  0x46   :  { %395 = vmatpush3.bf16.msra.mxu0 %v394_v24 }
  0x47   :  { %419 = vmatpush3.bf16.msra.mxu1 %v418_v25  ;;  %396 = vmatprep.subr.bf16.mxu0 %v540_v0 }
  0x48   :  { %420 = vmatprep.subr.bf16.mxu1 %v540_v0 }
  0x4a   :  { %398 = vmatpush3.bf16.msra.mxu0 %v397_v30 }
  0x4b   :  { %422 = vmatpush3.bf16.msra.mxu1 %v421_v31  ;;  %399 = vmatprep.subr.bf16.mxu0 %v540_v0 }
  0x4c   :  { %423 = vmatprep.subr.bf16.mxu1 %v540_v0 }
  0x4e   :  { %401 = vmatpush3.bf16.msra.mxu0 %v400_v36 }
  0x4f   :  { %425 = vmatpush3.bf16.msra.mxu1 %v424_v37  ;;  %402 = vmatprep.subr.bf16.mxu0 %v540_v0 }
  0x50   :  { %426 = vmatprep.subr.bf16.mxu1 %v540_v0 }
  0x52   :  { %404 = vmatpush3.bf16.msra.mxu0 %v403_v42 }
  0x53   :  { %428 = vmatpush3.bf16.msra.mxu1 %v427_v43  ;;  %405 = vmatprep.subr.bf16.mxu0 %v540_v0 }
  0x54   :  { %429 = vmatprep.subr.bf16.mxu1 %v540_v0 }
  0x56   :  { %407 = vmatpush3.bf16.msra.mxu0 %v406_v48 }
  0x57   :  { %431 = vmatpush3.bf16.msra.mxu1 %v430_v51 }
  0x59   :  { %347 = vmatmul.mubr.f32.vlgmr.msra.gmra.mrb[0].mxu0 %v87_v52 }
  0x5a   :  { %382 = vmatmul.mubr.f32.vlgmr.msra.gmra.mrb[0].mxu1 %v63_v49 }
 0x12c   :  { %v171_v54 = vpop.f32.mrb[0].mxu0 }
 0x12d   :  { %v181_v55 = vmul.f32 %v278_v53, %v171_v54  ;;  %v348_v56 = vpop.f32.mrb[1].mxu0  ;;  %v248_v57 = vpop.f32.mrb[0].mxu1 }
 0x12e   :  { %v383_v59 = vpop.f32.mrb[1].mxu1 }
 0x12f   :  { %v249_v60 = vadd.f32 %v248_v57, %v181_v55 }
 0x131   :  { %v259_v61 = vadd.f32 %v279_v58, %v249_v60 }
 0x133   :  { %260 = vst [vmem:[#allocation8] sm:$0xff] %v259_v61 }
 0x134   :  { %518 = shalt.err (!%p515_p0)
}
 0x135   :  { %s519_s17 = scalar_lea.hbm %s664_s6, 128 }
 0x136   :  { %p520_p1 = scmp.ne.s32.totalorder %s664_s6, %s519_s17  ;;  %p523_p2 = scmp.lt.u32.totalorder %s519_s17, %s664_s6 }
 0x138   :  { %p525_p3 = pnand %p523_p2, %p520_p1 }
 0x13a   :  { %528 = shalt.err (!%p525_p3)
}
 0x13b   :  { %270 = dma.vmem_to_hbm [thread:$0]  %s268_s14, 128, %s664_s6, [#allocation4]  }
 0x13c   :  { %533 = dma.done.wait [#allocation4], 128  }
 0x13d   :  { %534 = vsyncadd [#allocation4], 4294967168 }
 0x13e   :  { %274 = vsyncpa [#allocation3], 1 }
 0x13f   :  { %275 = vsyncpa [#allocation6], 1 }
 0x140   :  { %276 = vsyncpa [#allocation4], 1 }

</bundles_post_ra>
